<compile_context>
chip_gen: v5e
topology: v5e:2x2
jax: 0.10.0
libtpu: 0.0.40
codegen_flags: <defaults>
</compile_context>

<pallas_src>
from functools import partial

import jax
import jax.numpy as jnp
from jax.experimental import pallas as pl
from jax.experimental.pallas import tpu as pltpu

LN_EPS = 1e-5  # torch.nn.LayerNorm default eps
LANE = 128


def _round_up(x, m):
    return (x + m - 1) // m * m


def tabnet_kernel(num_residual, inv_mid,
                  x_ref,
                  wr_ref, br_ref,
                  wc_cat_ref, wc_real_ref, bc_ref,
                  wd_ref, gamma_ref, beta_ref,
                  wo_ref, bo_ref,
                  out_ref):
    x = x_ref[...]  # (tb, cat_dim + real_dim) bf16 — single merged input stream

    # liner_real_values: ReLU(real @ Wr + br). Wr is zero-padded over the cat
    # rows so the full merged x is used directly (no lane slicing in-kernel).
    real_v = (jnp.dot(x, wr_ref[...], preferred_element_type=jnp.float32)
              + br_ref[...])
    real_v = jnp.maximum(real_v, 0.0)

    # linear_collector on cat || ReLU(real)  (Dropout = identity):
    #   cat @ Wc[:cat_dim] == x @ Wc_cat_padded (zero rows over the real part).
    h = (jnp.dot(x, wc_cat_ref[...], preferred_element_type=jnp.float32)
         + jnp.dot(real_v.astype(wc_real_ref.dtype), wc_real_ref[...],
                   preferred_element_type=jnp.float32)
         + bc_ref[...])
    h = jnp.maximum(h, 0.0)                    # f32 (tb, mid)

    gamma = gamma_ref[...]                     # (1, mid) f32 — not expanded
    beta = beta_ref[...]                       # (1, mid) f32
    wd = wd_ref[...]                           # (mid, mid) bf16, bias=False

    # num_residual DenseResidual blocks sharing ONE set of weights
    # (PyTorch: [DenseResidual(params)] * num_residual).
    # TODO(synk): if production mid stays <= 64, lane-pack k = 128/mid rows per
    # vreg with segmented LN reductions to lift VPU/XLU lane utilization.
    for _ in range(num_residual):              # small static trip count
        y = jnp.dot(h.astype(wd.dtype), wd, preferred_element_type=jnp.float32)
        # One-pass LayerNorm (biased variance, matches PyTorch).
        s1 = jnp.sum(y, axis=-1, keepdims=True)
        s2 = jnp.sum(y * y, axis=-1, keepdims=True)
        mean = s1 * inv_mid
        var = s2 * inv_mid - mean * mean
        y = (y - mean) * jax.lax.rsqrt(var + LN_EPS) * gamma + beta
        h = h + jnp.maximum(y, 0.0)            # residual + ReLU, f32

    # head: Linear(mid, out_size) — wo/bo zero-padded to 128 output lanes.
    out = (jnp.dot(h.astype(wo_ref.dtype), wo_ref[...],
                   preferred_element_type=jnp.float32)
           + bo_ref[...])
    out_ref[...] = out.astype(out_ref.dtype)   # bf16 store: halves writeback


def tabnet_forward(x_cat, x_real, weights, num_residual, tile_b=8192):
    # --- glue: categorical embedding lookup + merge with real features -------
    # TODO(synk): move the embedding gather in-kernel (scalar-prefetch indices +
    # VMEM-resident one-hot matmuls over the tiny tables) to save the
    # cat_vector HBM round-trip.
    cat_vecs = [jnp.take(weights["embed"][name], x_cat[name], axis=0)
                for name in x_cat]
    cat_vector = jnp.concatenate(cat_vecs, axis=1)

    B = x_real.shape[0]
    cat_dim = cat_vector.shape[1]
    real_dim = x_real.shape[1]
    feat_in = cat_dim + real_dim
    mid = weights["wd"].shape[0]
    out_size = weights["wo"].shape[1]

    # Single merged bf16 input stream (one batch DMA instead of two skinny ones).
    x_in = jnp.concatenate([cat_vector, x_real], axis=1).astype(jnp.bfloat16)

    # Zero-row-padded weights so each batched dot uses the full merged operand:
    #   wr_pad rows [:cat_dim] = 0   -> x @ wr_pad     == real @ Wr
    #   wc_cat rows [cat_dim:] = 0   -> x @ wc_cat     == cat  @ Wc[:cat_dim]
    wr_pad = jnp.zeros((feat_in, real_dim), jnp.float32).at[cat_dim:].set(weights["wr"])
    wc_cat = jnp.zeros((feat_in, mid), jnp.float32).at[:cat_dim].set(weights["wc"][:cat_dim])
    wc_real = weights["wc"][cat_dim:]

    # Lane-dense padded head (unmasked vst on writeback).
    out_pad = _round_up(out_size, LANE)
    wo = jnp.zeros((mid, out_pad), jnp.float32).at[:, :out_size].set(weights["wo"])
    bo = jnp.zeros((1, out_pad), jnp.float32).at[:, :out_size].set(weights["bo"])

    # bf16 MXU operands / HBM bytes; biases & LN params stay f32.
    wr_pad = wr_pad.astype(jnp.bfloat16)
    wc_cat = wc_cat.astype(jnp.bfloat16)
    wc_real = wc_real.astype(jnp.bfloat16)
    wd = weights["wd"].astype(jnp.bfloat16)
    wo = wo.astype(jnp.bfloat16)

    # --- batch tiling: no dead whole tiles; even grid for v7x megacore -------
    n_steps = max(1, -(-B // tile_b))
    if B >= 2048:                       # feed both v7x TensorCores / balance grid
        if n_steps < 2:
            n_steps = 2
        if n_steps % 2:
            n_steps += 1
    tb = _round_up(-(-B // n_steps), 16)        # 16 = bf16 sublane packing
    B_pad = tb * n_steps
    if B_pad != B:
        x_in = jnp.pad(x_in, ((0, B_pad - B), (0, 0)))

    def resident(arr):
        # Full-array block, same block every grid step -> stays VMEM-resident.
        return pl.BlockSpec(arr.shape, lambda i: (0, 0))

    args = (x_in,
            wr_pad, weights["br"],
            wc_cat, wc_real, weights["bc"],
            wd, weights["gamma"], weights["beta"],
            wo, bo)
    in_specs = [pl.BlockSpec((tb, feat_in), lambda i: (i, 0))] + \
               [resident(a) for a in args[1:]]

    flops = 2 * B_pad * (feat_in * real_dim + feat_in * mid + real_dim * mid
                         + num_residual * mid * mid + mid * out_pad)
    bytes_accessed = (int(x_in.size) * 2 + B_pad * out_pad * 2
                      + sum(int(a.size) * a.dtype.itemsize for a in args[1:]))

    out = pl.pallas_call(
        partial(tabnet_kernel, num_residual, 1.0 / float(mid)),
        out_shape=jax.ShapeDtypeStruct((B_pad, out_pad), jnp.bfloat16),
        grid=(n_steps,),
        in_specs=in_specs,
        out_specs=pl.BlockSpec((tb, out_pad), lambda i: (i, 0)),
        compiler_params=pltpu.CompilerParams(
            dimension_semantics=("parallel",),
            vmem_limit_bytes=48 * 1024 * 1024),
        cost_estimate=pl.CostEstimate(
            flops=flops,
            transcendentals=B_pad * num_residual,
            bytes_accessed=bytes_accessed),
    )(*args)
    return out[:B, :out_size].astype(jnp.float32)


def tabnet_reference(x_cat, x_real, weights, num_residual):
    """Pure-JAX f32 reference of the PyTorch forward (eval mode)."""
    cat_vecs = [jnp.take(weights["embed"][n], x_cat[n], axis=0) for n in x_cat]
    cat_v = jnp.concatenate(cat_vecs, axis=1)
    real_v = jnp.maximum(x_real @ weights["wr"] + weights["br"], 0.0)
    v = jnp.concatenate([cat_v, real_v], axis=1)
    h = jnp.maximum(v @ weights["wc"] + weights["bc"], 0.0)
    for _ in range(num_residual):
        y = h @ weights["wd"]
        mean = jnp.mean(y, axis=-1, keepdims=True)
        var = jnp.mean((y - mean) ** 2, axis=-1, keepdims=True)
        y = (y - mean) / jnp.sqrt(var + LN_EPS) * weights["gamma"] + weights["beta"]
        h = h + jnp.maximum(y, 0.0)
    return h @ weights["wo"] + weights["bo"]


if __name__ == "__main__":
    # Small config consistent with the module's __init__.
    B = 8
    cat_embed_sizes = {"f1": (10, 8), "f2": (7, 8)}  # (num_categories, embedding_dim)
    real_features_size = 16
    cat_dim = sum(d for _, d in cat_embed_sizes.values())      # 16
    input_concat_vector_size = cat_dim + real_features_size    # 32
    mid_features = 32
    out_size = 8
    num_residual = 3

    key = jax.random.PRNGKey(0)
    ks = jax.random.split(key, 16)

    def init(k, shape, scale=0.1):
        return (scale * jax.random.normal(k, shape)).astype(jnp.float32)

    weights = {
        "embed": {
            "f1": init(ks[0], cat_embed_sizes["f1"]),
            "f2": init(ks[1], cat_embed_sizes["f2"]),
        },
        # liner_real_values: Linear(real, real) — stored as [in, out]
        "wr": init(ks[2], (real_features_size, real_features_size)),
        "br": init(ks[3], (1, real_features_size)),
        # linear_collector: Linear(input_concat_vector_size, mid_features)
        "wc": init(ks[4], (input_concat_vector_size, mid_features)),
        "bc": init(ks[5], (1, mid_features)),
        # shared DenseResidual Linear (bias=False because layer_norm=True)
        "wd": init(ks[6], (mid_features, mid_features)),
        "gamma": jnp.ones((1, mid_features), jnp.float32),
        "beta": jnp.zeros((1, mid_features), jnp.float32),
        # head: Linear(mid_features, out_size)
        "wo": init(ks[7], (mid_features, out_size)),
        "bo": init(ks[8], (1, out_size)),
    }

    x_cat = {
        "f1": jax.random.randint(ks[9], (B,), 0, cat_embed_sizes["f1"][0]),
        "f2": jax.random.randint(ks[10], (B,), 0, cat_embed_sizes["f2"][0]),
    }
    x_real = init(ks[11], (B, real_features_size), scale=1.0)

    out = tabnet_forward(x_cat, x_real, weights, num_residual)
    jax.block_until_ready(out)
    assert out.shape == (B, out_size)

    ref = tabnet_reference(x_cat, x_real, weights, num_residual)
    max_err = float(jnp.max(jnp.abs(out - ref)))
    assert max_err < 3e-2, f"max abs error {max_err}"
    print("KERNEL_OK")
</pallas_src>

<mosaic_0001>
module attributes {stable_mosaic.version = 11 : i64} {
  func.func @tabnet_kernel(%arg0: i32, %arg1: memref<16x32xbf16, #tpu.memory_space<vmem>>, %arg2: memref<32x16xbf16, #tpu.memory_space<vmem>>, %arg3: memref<1x16xf32, #tpu.memory_space<vmem>>, %arg4: memref<32x32xbf16, #tpu.memory_space<vmem>>, %arg5: memref<16x32xbf16, #tpu.memory_space<vmem>>, %arg6: memref<1x32xf32, #tpu.memory_space<vmem>>, %arg7: memref<32x32xbf16, #tpu.memory_space<vmem>>, %arg8: memref<1x32xf32, #tpu.memory_space<vmem>>, %arg9: memref<1x32xf32, #tpu.memory_space<vmem>>, %arg10: memref<32x128xbf16, #tpu.memory_space<vmem>>, %arg11: memref<1x128xf32, #tpu.memory_space<vmem>>, %arg12: memref<16x128xbf16, #tpu.memory_space<vmem>>) attributes {dimension_semantics = [#tpu.dimension_semantics<parallel>], iteration_bounds = array<i64: 1>, scalar_prefetch = 0 : i64, scratch_operands = 0 : i64, tpu.core_type = #tpu.core_type<tc>, window_params = [{transform_indices = @transform_0, window_bounds = array<i64: 16, 32>}, {pipeline_mode = #tpu.pipeline_mode<synchronous>, transform_indices = @transform_1, window_bounds = array<i64: 32, 16>}, {pipeline_mode = #tpu.pipeline_mode<synchronous>, transform_indices = @transform_2, window_bounds = array<i64: 1, 16>}, {pipeline_mode = #tpu.pipeline_mode<synchronous>, transform_indices = @transform_3, window_bounds = array<i64: 32, 32>}, {pipeline_mode = #tpu.pipeline_mode<synchronous>, transform_indices = @transform_4, window_bounds = array<i64: 16, 32>}, {pipeline_mode = #tpu.pipeline_mode<synchronous>, transform_indices = @transform_5, window_bounds = array<i64: 1, 32>}, {pipeline_mode = #tpu.pipeline_mode<synchronous>, transform_indices = @transform_6, window_bounds = array<i64: 32, 32>}, {pipeline_mode = #tpu.pipeline_mode<synchronous>, transform_indices = @transform_7, window_bounds = array<i64: 1, 32>}, {pipeline_mode = #tpu.pipeline_mode<synchronous>, transform_indices = @transform_8, window_bounds = array<i64: 1, 32>}, {pipeline_mode = #tpu.pipeline_mode<synchronous>, transform_indices = @transform_9, window_bounds = array<i64: 32, 128>}, {pipeline_mode = #tpu.pipeline_mode<synchronous>, transform_indices = @transform_10, window_bounds = array<i64: 1, 128>}, {transform_indices = @transform_11, window_bounds = array<i64: 16, 128>}]} {
    %c0 = arith.constant 0 : index
    %c0_0 = arith.constant 0 : index
    %0 = vector.load %arg1[%c0, %c0_0] : memref<16x32xbf16, #tpu.memory_space<vmem>>, vector<16x32xbf16>
    %c0_1 = arith.constant 0 : index
    %c0_2 = arith.constant 0 : index
    %1 = vector.load %arg2[%c0_1, %c0_2] : memref<32x16xbf16, #tpu.memory_space<vmem>>, vector<32x16xbf16>
    %cst = arith.constant dense<0.000000e+00> : vector<16x16xf32>
    %2 = tpu.matmul %0, %1, %cst {dimension_numbers = #tpu.dot_dimension_numbers<[1], [0], [0], [1], [0, 0, 1, 1], [], []>} : vector<16x32xbf16>, vector<32x16xbf16>, vector<16x16xf32> -> vector<16x16xf32>
    %c0_3 = arith.constant 0 : index
    %c0_4 = arith.constant 0 : index
    %3 = vector.load %arg3[%c0_3, %c0_4] : memref<1x16xf32, #tpu.memory_space<vmem>>, vector<1x16xf32>
    %4 = vector.broadcast %3 : vector<1x16xf32> to vector<16x16xf32>
    %5 = arith.addf %2, %4 : vector<16x16xf32>
    %cst_5 = arith.constant 0.000000e+00 : f32
    %6 = vector.broadcast %cst_5 : f32 to vector<16x16xf32>
    %7 = arith.maximumf %5, %6 : vector<16x16xf32>
    %c0_6 = arith.constant 0 : index
    %c0_7 = arith.constant 0 : index
    %8 = vector.load %arg4[%c0_6, %c0_7] : memref<32x32xbf16, #tpu.memory_space<vmem>>, vector<32x32xbf16>
    %cst_8 = arith.constant dense<0.000000e+00> : vector<16x32xf32>
    %9 = tpu.matmul %0, %8, %cst_8 {dimension_numbers = #tpu.dot_dimension_numbers<[1], [0], [0], [1], [0, 0, 1, 1], [], []>} : vector<16x32xbf16>, vector<32x32xbf16>, vector<16x32xf32> -> vector<16x32xf32>
    %10 = arith.truncf %7 : vector<16x16xf32> to vector<16x16xbf16>
    %c0_9 = arith.constant 0 : index
    %c0_10 = arith.constant 0 : index
    %11 = vector.load %arg5[%c0_9, %c0_10] : memref<16x32xbf16, #tpu.memory_space<vmem>>, vector<16x32xbf16>
    %cst_11 = arith.constant dense<0.000000e+00> : vector<16x32xf32>
    %12 = tpu.matmul %10, %11, %cst_11 {dimension_numbers = #tpu.dot_dimension_numbers<[1], [0], [0], [1], [0, 0, 1, 1], [], []>} : vector<16x16xbf16>, vector<16x32xbf16>, vector<16x32xf32> -> vector<16x32xf32>
    %13 = arith.addf %9, %12 : vector<16x32xf32>
    %c0_12 = arith.constant 0 : index
    %c0_13 = arith.constant 0 : index
    %14 = vector.load %arg6[%c0_12, %c0_13] : memref<1x32xf32, #tpu.memory_space<vmem>>, vector<1x32xf32>
    %15 = vector.broadcast %14 : vector<1x32xf32> to vector<16x32xf32>
    %16 = arith.addf %13, %15 : vector<16x32xf32>
    %cst_14 = arith.constant 0.000000e+00 : f32
    %17 = vector.broadcast %cst_14 : f32 to vector<16x32xf32>
    %18 = arith.maximumf %16, %17 : vector<16x32xf32>
    %c0_15 = arith.constant 0 : index
    %c0_16 = arith.constant 0 : index
    %19 = vector.load %arg8[%c0_15, %c0_16] : memref<1x32xf32, #tpu.memory_space<vmem>>, vector<1x32xf32>
    %c0_17 = arith.constant 0 : index
    %c0_18 = arith.constant 0 : index
    %20 = vector.load %arg9[%c0_17, %c0_18] : memref<1x32xf32, #tpu.memory_space<vmem>>, vector<1x32xf32>
    %c0_19 = arith.constant 0 : index
    %c0_20 = arith.constant 0 : index
    %21 = vector.load %arg7[%c0_19, %c0_20] : memref<32x32xbf16, #tpu.memory_space<vmem>>, vector<32x32xbf16>
    %22 = arith.truncf %18 : vector<16x32xf32> to vector<16x32xbf16>
    %cst_21 = arith.constant dense<0.000000e+00> : vector<16x32xf32>
    %23 = tpu.matmul %22, %21, %cst_21 {dimension_numbers = #tpu.dot_dimension_numbers<[1], [0], [0], [1], [0, 0, 1, 1], [], []>} : vector<16x32xbf16>, vector<32x32xbf16>, vector<16x32xf32> -> vector<16x32xf32>
    %cst_22 = arith.constant dense<0.000000e+00> : vector<16xf32>
    %24 = vector.multi_reduction <add>, %23, %cst_22 [1] : vector<16x32xf32> to vector<16xf32>
    %25 = vector.shape_cast %24 : vector<16xf32> to vector<16x1xf32>
    %26 = arith.mulf %23, %23 : vector<16x32xf32>
    %cst_23 = arith.constant dense<0.000000e+00> : vector<16xf32>
    %27 = vector.multi_reduction <add>, %26, %cst_23 [1] : vector<16x32xf32> to vector<16xf32>
    %28 = vector.shape_cast %27 : vector<16xf32> to vector<16x1xf32>
    %cst_24 = arith.constant 3.125000e-02 : f32
    %29 = vector.broadcast %cst_24 : f32 to vector<16x1xf32>
    %30 = arith.mulf %25, %29 : vector<16x1xf32>
    %cst_25 = arith.constant 3.125000e-02 : f32
    %31 = vector.broadcast %cst_25 : f32 to vector<16x1xf32>
    %32 = arith.mulf %28, %31 : vector<16x1xf32>
    %33 = arith.mulf %30, %30 : vector<16x1xf32>
    %34 = arith.subf %32, %33 : vector<16x1xf32>
    %35 = vector.broadcast %30 : vector<16x1xf32> to vector<16x32xf32>
    %36 = arith.subf %23, %35 : vector<16x32xf32>
    %cst_26 = arith.constant 9.99999974E-6 : f32
    %37 = vector.broadcast %cst_26 : f32 to vector<16x1xf32>
    %38 = arith.addf %34, %37 : vector<16x1xf32>
    %39 = math.rsqrt %38 : vector<16x1xf32>
    %40 = vector.broadcast %39 : vector<16x1xf32> to vector<16x32xf32>
    %41 = arith.mulf %36, %40 : vector<16x32xf32>
    %42 = vector.broadcast %19 : vector<1x32xf32> to vector<16x32xf32>
    %43 = arith.mulf %41, %42 : vector<16x32xf32>
    %44 = vector.broadcast %20 : vector<1x32xf32> to vector<16x32xf32>
    %45 = arith.addf %43, %44 : vector<16x32xf32>
    %cst_27 = arith.constant 0.000000e+00 : f32
    %46 = vector.broadcast %cst_27 : f32 to vector<16x32xf32>
    %47 = arith.maximumf %45, %46 : vector<16x32xf32>
    %48 = arith.addf %18, %47 : vector<16x32xf32>
    %49 = arith.truncf %48 : vector<16x32xf32> to vector<16x32xbf16>
    %cst_28 = arith.constant dense<0.000000e+00> : vector<16x32xf32>
    %50 = tpu.matmul %49, %21, %cst_28 {dimension_numbers = #tpu.dot_dimension_numbers<[1], [0], [0], [1], [0, 0, 1, 1], [], []>} : vector<16x32xbf16>, vector<32x32xbf16>, vector<16x32xf32> -> vector<16x32xf32>
    %cst_29 = arith.constant dense<0.000000e+00> : vector<16xf32>
    %51 = vector.multi_reduction <add>, %50, %cst_29 [1] : vector<16x32xf32> to vector<16xf32>
    %52 = vector.shape_cast %51 : vector<16xf32> to vector<16x1xf32>
    %53 = arith.mulf %50, %50 : vector<16x32xf32>
    %cst_30 = arith.constant dense<0.000000e+00> : vector<16xf32>
    %54 = vector.multi_reduction <add>, %53, %cst_30 [1] : vector<16x32xf32> to vector<16xf32>
    %55 = vector.shape_cast %54 : vector<16xf32> to vector<16x1xf32>
    %cst_31 = arith.constant 3.125000e-02 : f32
    %56 = vector.broadcast %cst_31 : f32 to vector<16x1xf32>
    %57 = arith.mulf %52, %56 : vector<16x1xf32>
    %cst_32 = arith.constant 3.125000e-02 : f32
    %58 = vector.broadcast %cst_32 : f32 to vector<16x1xf32>
    %59 = arith.mulf %55, %58 : vector<16x1xf32>
    %60 = arith.mulf %57, %57 : vector<16x1xf32>
    %61 = arith.subf %59, %60 : vector<16x1xf32>
    %62 = vector.broadcast %57 : vector<16x1xf32> to vector<16x32xf32>
    %63 = arith.subf %50, %62 : vector<16x32xf32>
    %cst_33 = arith.constant 9.99999974E-6 : f32
    %64 = vector.broadcast %cst_33 : f32 to vector<16x1xf32>
    %65 = arith.addf %61, %64 : vector<16x1xf32>
    %66 = math.rsqrt %65 : vector<16x1xf32>
    %67 = vector.broadcast %66 : vector<16x1xf32> to vector<16x32xf32>
    %68 = arith.mulf %63, %67 : vector<16x32xf32>
    %69 = vector.broadcast %19 : vector<1x32xf32> to vector<16x32xf32>
    %70 = arith.mulf %68, %69 : vector<16x32xf32>
    %71 = vector.broadcast %20 : vector<1x32xf32> to vector<16x32xf32>
    %72 = arith.addf %70, %71 : vector<16x32xf32>
    %cst_34 = arith.constant 0.000000e+00 : f32
    %73 = vector.broadcast %cst_34 : f32 to vector<16x32xf32>
    %74 = arith.maximumf %72, %73 : vector<16x32xf32>
    %75 = arith.addf %48, %74 : vector<16x32xf32>
    %76 = arith.truncf %75 : vector<16x32xf32> to vector<16x32xbf16>
    %cst_35 = arith.constant dense<0.000000e+00> : vector<16x32xf32>
    %77 = tpu.matmul %76, %21, %cst_35 {dimension_numbers = #tpu.dot_dimension_numbers<[1], [0], [0], [1], [0, 0, 1, 1], [], []>} : vector<16x32xbf16>, vector<32x32xbf16>, vector<16x32xf32> -> vector<16x32xf32>
    %cst_36 = arith.constant dense<0.000000e+00> : vector<16xf32>
    %78 = vector.multi_reduction <add>, %77, %cst_36 [1] : vector<16x32xf32> to vector<16xf32>
    %79 = vector.shape_cast %78 : vector<16xf32> to vector<16x1xf32>
    %80 = arith.mulf %77, %77 : vector<16x32xf32>
    %cst_37 = arith.constant dense<0.000000e+00> : vector<16xf32>
    %81 = vector.multi_reduction <add>, %80, %cst_37 [1] : vector<16x32xf32> to vector<16xf32>
    %82 = vector.shape_cast %81 : vector<16xf32> to vector<16x1xf32>
    %cst_38 = arith.constant 3.125000e-02 : f32
    %83 = vector.broadcast %cst_38 : f32 to vector<16x1xf32>
    %84 = arith.mulf %79, %83 : vector<16x1xf32>
    %cst_39 = arith.constant 3.125000e-02 : f32
    %85 = vector.broadcast %cst_39 : f32 to vector<16x1xf32>
    %86 = arith.mulf %82, %85 : vector<16x1xf32>
    %87 = arith.mulf %84, %84 : vector<16x1xf32>
    %88 = arith.subf %86, %87 : vector<16x1xf32>
    %89 = vector.broadcast %84 : vector<16x1xf32> to vector<16x32xf32>
    %90 = arith.subf %77, %89 : vector<16x32xf32>
    %cst_40 = arith.constant 9.99999974E-6 : f32
    %91 = vector.broadcast %cst_40 : f32 to vector<16x1xf32>
    %92 = arith.addf %88, %91 : vector<16x1xf32>
    %93 = math.rsqrt %92 : vector<16x1xf32>
    %94 = vector.broadcast %93 : vector<16x1xf32> to vector<16x32xf32>
    %95 = arith.mulf %90, %94 : vector<16x32xf32>
    %96 = vector.broadcast %19 : vector<1x32xf32> to vector<16x32xf32>
    %97 = arith.mulf %95, %96 : vector<16x32xf32>
    %98 = vector.broadcast %20 : vector<1x32xf32> to vector<16x32xf32>
    %99 = arith.addf %97, %98 : vector<16x32xf32>
    %cst_41 = arith.constant 0.000000e+00 : f32
    %100 = vector.broadcast %cst_41 : f32 to vector<16x32xf32>
    %101 = arith.maximumf %99, %100 : vector<16x32xf32>
    %102 = arith.addf %75, %101 : vector<16x32xf32>
    %103 = arith.truncf %102 : vector<16x32xf32> to vector<16x32xbf16>
    %c0_42 = arith.constant 0 : index
    %c0_43 = arith.constant 0 : index
    %104 = vector.load %arg10[%c0_42, %c0_43] : memref<32x128xbf16, #tpu.memory_space<vmem>>, vector<32x128xbf16>
    %cst_44 = arith.constant dense<0.000000e+00> : vector<16x128xf32>
    %105 = tpu.matmul %103, %104, %cst_44 {dimension_numbers = #tpu.dot_dimension_numbers<[1], [0], [0], [1], [0, 0, 1, 1], [], []>} : vector<16x32xbf16>, vector<32x128xbf16>, vector<16x128xf32> -> vector<16x128xf32>
    %c0_45 = arith.constant 0 : index
    %c0_46 = arith.constant 0 : index
    %106 = vector.load %arg11[%c0_45, %c0_46] : memref<1x128xf32, #tpu.memory_space<vmem>>, vector<1x128xf32>
    %107 = vector.broadcast %106 : vector<1x128xf32> to vector<16x128xf32>
    %108 = arith.addf %105, %107 : vector<16x128xf32>
    %109 = arith.truncf %108 : vector<16x128xf32> to vector<16x128xbf16>
    %c0_47 = arith.constant 0 : index
    %c0_48 = arith.constant 0 : index
    %110 = vector.load %arg12[%c0_47, %c0_48] : memref<16x128xbf16, #tpu.memory_space<vmem>>, vector<16x128xbf16>
    tpu.vector_store %arg12[%c0_47, %c0_48], %109 {strides = array<i32>} : memref<16x128xbf16, #tpu.memory_space<vmem>>, vector<16x128xbf16>,
    return
  }
  func.func @transform_0(%arg0: i32) -> (i32, i32) {
    %c0_i32 = arith.constant 0 : i32
    %c0_i32_0 = arith.constant 0 : i32
    return %arg0, %c0_i32 : i32, i32
  }
  func.func @transform_1(%arg0: i32) -> (i32, i32) {
    %c0_i32 = arith.constant 0 : i32
    %c0_i32_0 = arith.constant 0 : i32
    %c0_i32_1 = arith.constant 0 : i32
    return %c0_i32, %c0_i32_0 : i32, i32
  }
  func.func @transform_2(%arg0: i32) -> (i32, i32) {
    %c0_i32 = arith.constant 0 : i32
    %c0_i32_0 = arith.constant 0 : i32
    %c0_i32_1 = arith.constant 0 : i32
    return %c0_i32, %c0_i32_0 : i32, i32
  }
  func.func @transform_3(%arg0: i32) -> (i32, i32) {
    %c0_i32 = arith.constant 0 : i32
    %c0_i32_0 = arith.constant 0 : i32
    %c0_i32_1 = arith.constant 0 : i32
    return %c0_i32, %c0_i32_0 : i32, i32
  }
  func.func @transform_4(%arg0: i32) -> (i32, i32) {
    %c0_i32 = arith.constant 0 : i32
    %c0_i32_0 = arith.constant 0 : i32
    %c0_i32_1 = arith.constant 0 : i32
    return %c0_i32, %c0_i32_0 : i32, i32
  }
  func.func @transform_5(%arg0: i32) -> (i32, i32) {
    %c0_i32 = arith.constant 0 : i32
    %c0_i32_0 = arith.constant 0 : i32
    %c0_i32_1 = arith.constant 0 : i32
    return %c0_i32, %c0_i32_0 : i32, i32
  }
  func.func @transform_6(%arg0: i32) -> (i32, i32) {
    %c0_i32 = arith.constant 0 : i32
    %c0_i32_0 = arith.constant 0 : i32
    %c0_i32_1 = arith.constant 0 : i32
    return %c0_i32, %c0_i32_0 : i32, i32
  }
  func.func @transform_7(%arg0: i32) -> (i32, i32) {
    %c0_i32 = arith.constant 0 : i32
    %c0_i32_0 = arith.constant 0 : i32
    %c0_i32_1 = arith.constant 0 : i32
    return %c0_i32, %c0_i32_0 : i32, i32
  }
  func.func @transform_8(%arg0: i32) -> (i32, i32) {
    %c0_i32 = arith.constant 0 : i32
    %c0_i32_0 = arith.constant 0 : i32
    %c0_i32_1 = arith.constant 0 : i32
    return %c0_i32, %c0_i32_0 : i32, i32
  }
  func.func @transform_9(%arg0: i32) -> (i32, i32) {
    %c0_i32 = arith.constant 0 : i32
    %c0_i32_0 = arith.constant 0 : i32
    %c0_i32_1 = arith.constant 0 : i32
    return %c0_i32, %c0_i32_0 : i32, i32
  }
  func.func @transform_10(%arg0: i32) -> (i32, i32) {
    %c0_i32 = arith.constant 0 : i32
    %c0_i32_0 = arith.constant 0 : i32
    %c0_i32_1 = arith.constant 0 : i32
    return %c0_i32, %c0_i32_0 : i32, i32
  }
  func.func @transform_11(%arg0: i32) -> (i32, i32) {
    %c0_i32 = arith.constant 0 : i32
    %c0_i32_0 = arith.constant 0 : i32
    return %arg0, %c0_i32 : i32, i32
  }
}

</mosaic_0001>

<bundles_post_ra>
// kernel: tpu_custom_call.1
= control target key start
LH: loop header
LB: loop body
LE: loop exit
PB: predicated region body
PF: predicated region fallthrough
CT: control target
= control target key end

     0   :  { %16 = vsyncpa [#allocation3], 0  ;;  %s1037_s0 = inlined_call_operand.hbm [shape: bf16[16,32], index: 0, kind: input, shape index: {}]   ;;  %s1038_s1 = inlined_call_operand.vmem [shape: bf16[32,16], index: 1, kind: input, shape index: {}]   ;;  %s1039_s2 = inlined_call_operand.hbm [shape: f32[1,16], index: 2, kind: input, shape index: {}]   ;;  %s1040_s3 = inlined_call_operand.vmem [shape: bf16[32,32], index: 3, kind: input, shape index: {}]   ;;  %s1041_s4 = inlined_call_operand.hbm [shape: bf16[16,32], index: 4, kind: input, shape index: {}]   ;;  %s1042_s5 = inlined_call_operand.hbm [shape: f32[1,32], index: 5, kind: input, shape index: {}]   ;;  %s1043_s6 = inlined_call_operand.hbm [shape: bf16[32,32], index: 6, kind: input, shape index: {}]   ;;  %s1044_s7 = inlined_call_operand.hbm [shape: f32[1,32], index: 7, kind: input, shape index: {}]   ;;  %s1045_s8 = inlined_call_operand.hbm [shape: f32[1,32], index: 8, kind: input, shape index: {}]   ;;  %s1046_s9 = inlined_call_operand.vmem [shape: bf16[32,128], index: 9, kind: input, shape index: {}]   ;;  %s1047_s10 = inlined_call_operand.vmem [shape: f32[1,128], index: 10, kind: input, shape index: {}]   ;;  %s1048_s11 = inlined_call_operand.hbm [shape: bf16[16,128], index: 11, kind: output, shape index: {}]  }
   0x1   :  { %17 = vsyncpa [#allocation6], 0 }
   0x2   :  { %18 = vsyncpa [#allocation9], 0 }
   0x3   :  { %19 = vsyncpa [#allocation12], 0  ;;  %s41_s19 = sshll.u32 %s1039_s2, 4  ;;  %s42_s19 = int_to_ptr.hbm [resolvable:$true] %s41_s19 }
   0x4   :  { %20 = vsyncpa [#allocation4], 0  ;;  %s854_s20 = smov [#allocation5]   ;;  %s67_s24 = sshll.u32 %s1042_s5, 4  ;;  %s68_s24 = int_to_ptr.hbm [resolvable:$true] %s67_s24 }
   0x5   :  { %s43_s21 = sshll.u32 %s854_s20, 4  ;;  %s855_s25 = smov [#allocation8]   ;;  %s44_s21 = int_to_ptr.vmem [resolvable:$true] %s43_s21 }
   0x6   :  { %46 = dma.hbm_to_vmem [thread:$0]  %s42_s19, 16, %s44_s21, [#allocation6]  }
   0x7   :  { %s69_s26 = sshll.u32 %s855_s25, 4  ;;  %s91_s29 = sshll.u32 %s1044_s7, 4  ;;  %s70_s26 = int_to_ptr.vmem [resolvable:$true] %s69_s26  ;;  %s92_s29 = int_to_ptr.hbm [resolvable:$true] %s91_s29 }
   0x8   :  { %72 = dma.hbm_to_vmem [thread:$0]  %s68_s24, 16, %s70_s26, [#allocation9]  }
   0x9   :  { %s25_s12 = sshll.u32 %s1037_s0, 4  ;;  %s856_s13 = smov [#allocation11]   ;;  %s26_s12 = int_to_ptr.hbm [resolvable:$true] %s25_s12 }
   0xa   :  { %s93_s14 = sshll.u32 %s856_s13, 4  ;;  %s857_s5 = smov [#allocation2]   ;;  %s94_s14 = int_to_ptr.vmem [resolvable:$true] %s93_s14 }
   0xb   :  { %96 = dma.hbm_to_vmem [thread:$0]  %s92_s29, 16, %s94_s14, [#allocation12]  }
   0xc   :  { %s27_s15 = sshll.u32 %s857_s5, 4  ;;  %s858_s16 = smov 64   ;;  %s28_s15 = int_to_ptr.vmem [resolvable:$true] %s27_s15 }
   0xd   :  { %s859_s17 = smov 4   ;;  %s53_s19 = sshll.u32 %s1041_s4, 4  ;;  %s54_s19 = int_to_ptr.hbm [resolvable:$true] %s53_s19 }
   0xe   :  { %33 = dma.hbm_to_vmem [thread:$0]  %s26_s12, 128, %s28_s15, [#allocation3], %s858_s16, %s858_s16, %s859_s17  }
   0xf   :  { %s860_s0 = smov [#allocation7]   ;;  %s77_s23 = sshll.u32 %s1043_s6, 4  ;;  %s78_s23 = int_to_ptr.hbm [resolvable:$true] %s77_s23 }
  0x10   :  { %s55_s20 = sshll.u32 %s860_s0, 4  ;;  %s861_s24 = smov [#allocation10]   ;;  %s56_s20 = int_to_ptr.vmem [resolvable:$true] %s55_s20 }
  0x11   :  { %61 = dma.hbm_to_vmem [thread:$0]  %s54_s19, 128, %s56_s20, [#allocation6], %s858_s16, %s858_s16, %s859_s17  }
  0x12   :  { %s79_s25 = sshll.u32 %s861_s24, 4  ;;  %s102_s28 = sshll.u32 %s1045_s8, 4  ;;  %s80_s25 = int_to_ptr.vmem [resolvable:$true] %s79_s25  ;;  %s103_s28 = int_to_ptr.hbm [resolvable:$true] %s102_s28 }
  0x13   :  { %85 = dma.hbm_to_vmem [thread:$0]  %s78_s23, 256, %s80_s25, [#allocation9], %s858_s16, %s858_s16, %s859_s17  }
  0x14   :  { %s862_s4 = smov [#allocation13]  }
  0x15   :  { %s104_s29 = sshll.u32 %s862_s4, 4  ;;  %s105_s29 = int_to_ptr.vmem [resolvable:$true] %s104_s29 }
  0x16   :  { %107 = dma.hbm_to_vmem [thread:$0]  %s103_s28, 16, %s105_s29, [#allocation12]  }
  0x17   :  { %844 = dma.done.wait [#allocation3], 128  }
  0x18   :  { %845 = vsyncadd [#allocation3], 4294967168 }
  0x19   :  { %846 = dma.done.wait [#allocation6], 144  }
  0x1a   :  { %847 = vsyncadd [#allocation6], 4294967152 }
  0x1b   :  { %848 = dma.done.wait [#allocation9], 272  }
  0x1c   :  { %849 = vsyncadd [#allocation9], 4294967024 }
  0x1d   :  { %850 = dma.done.wait [#allocation12], 32  }
  0x1e   :  { %851 = vsyncadd [#allocation12], 4294967264  ;;  %v612_v0 = vld [vmem:[%s1038_s1 + $0x8] sm:$0xff]  ;;  %v611_v2 = vld [vmem:[%s1038_s1] sm:$0xff]  ;;  %vm168_vm0 = vcmask 261120   ;;  %vm201_vm1 = vcmask 130048  }
  0x1f   :  { %v614_v1 = vld [vmem:[%s1040_s3 + $0x8] sm:$0xff]  ;;  %178 = vmatpush.bf16.msra.mxu0 %v612_v0  ;;  %v613_v3 = vld [vmem:[%s1040_s3] sm:$0xff]  ;;  %v616_v15 = vld [vmem:[#allocation10] sm:$0xff]  ;;  %s863_s19 = smov [#allocation14]   ;;  %s547_s22 = sshll.u32 %s1048_s11, 4  ;;  %s548_s22 = int_to_ptr.hbm [resolvable:$true] %s547_s22 }
  0x20   :  { %237 = vmatpush.bf16.msra.mxu2 %v614_v1  ;;  %v610_v4 = vld [vmem:[#allocation2] sm:$0xff]  ;;  %v615_v5 = vld [vmem:[#allocation7] sm:$0xff]  ;;  %v635_v7 = vld [vmem:[#allocation5] ss:$0 sm:$0xff]  ;;  %s545_s0 = sshll.u32 %s863_s19, 4  ;;  %s546_s0 = int_to_ptr.vmem [resolvable:$true] %s545_s0 }
  0x21   :  { %212 = vmatpush.bf16.msra.mxu1 %v615_v5  ;;  %v617_v14 = vld [vmem:[#allocation10 + $0x8] sm:$0xff]  ;;  %v636_v19 = vld [vmem:[#allocation8] ss:$0 sm:$0xff]  ;;  %v983_v61 = vld [vmem:[#allocation11] ss:$0 sm:$0xff] }
  0x22   :  { %281 = vmatpush.bf16.msra.mxu3 %v617_v14 }
  0x23   :  { %179 = vmatpush.bf16.msra.mxu0 %v611_v2  ;;  %v986_v2 = vld [vmem:[#allocation13] ss:$0 sm:$0xff] }
  0x24   :  { %238 = vmatpush.bf16.msra.mxu2 %v613_v3 }
  0x25   :  { %361 = vmatpush.bf16.msrb.mxu1 %v617_v14 }
  0x26   :  { %575 = vmatmul.msk.bf16.vlgmr.msra.gmra.mxu0 %vm168_vm0, %v610_v4  ;;  %282 = vmatpush.bf16.msra.mxu3 %v616_v15 }
  0x27   :  { %589 = vmatmul.msk.bf16.vlgmr.msra.gmra.mxu2 %vm168_vm0, %v610_v4  ;;  %435 = vmatpush.bf16.msrb.mxu0 %v617_v14 }
  0x29   :  { %362 = vmatpush.bf16.msrb.mxu1 %v616_v15 }
  0x2b   :  { %436 = vmatpush.bf16.msrb.mxu0 %v616_v15 }
  0xa3   :  { %v181_v6 = vpop.f32.mrf.mxu0 }
  0xa4   :  { %v182_v8 = vadd.f32 %v635_v7, %v181_v6 }
  0xa6   :  { %v186_v11 = vmax.f32 %v182_v8, 0.0 }
  0xaa   :  { %v240_v16 = vpop.f32.mrf.mxu2 }
  0xab   :  { %v183_v9 = vpop.f32.mrf.mxu0 }
  0xac   :  { %v184_v10 = vadd.f32 %v635_v7, %v183_v9 }
  0xae   :  { %v187_v12 = vmax.f32 %v184_v10, 0.0 }
  0xb0   :  { %v192_v13 = vpack.c.bf16 %v187_v12, %v186_v11 }
  0xb2   :  { %580 = vmatmul.msk.bf16.vlgmr.msra.gmra.mxu1 %vm201_vm1, %v192_v13  ;;  %v242_v20 = vpop.f32.mrf.mxu2 }
 0x12f   :  { %v214_v17 = vpop.f32.mrf.mxu1 }
 0x130   :  { %v241_v18 = vadd.f32 %v240_v16, %v214_v17 }
 0x132   :  { %v968_v22 = vadd.f32 %v636_v19, %v241_v18 }
 0x134   :  { %v251_v25 = vmax.f32 %v968_v22, 0.0 }
 0x137   :  { %v216_v21 = vpop.f32.mrf.mxu1 }
 0x138   :  { %v243_v23 = vadd.f32 %v242_v20, %v216_v21 }
 0x13a   :  { %v970_v24 = vadd.f32 %v636_v19, %v243_v23 }
 0x13c   :  { %v252_v26 = vmax.f32 %v970_v24, 0.0 }
 0x13e   :  { %v259_v27 = vpack.c.bf16 %v252_v26, %v251_v25 }
 0x140   :  { %598 = vmatmul.msk.bf16.vlgmr.msra.gmra.mxu3 %vm168_vm0, %v259_v27 }
 0x1c3   :  { %v284_v28 = vpop.f32.mrf.mxu3 }
 0x1c4   :  { %v289_v29 = vsel %vm168_vm0, %v284_v28, 0.0  ;;  %v295_v30 = vmul.f32 %v284_v28, %v284_v28 }
 0x1c5   :  { %290 = vadd.xlane.f32.xlu0 %v289_v29 }
 0x1c6   :  { %v297_v31 = vsel %vm168_vm0, %v295_v30, 0.0 }
 0x1c7   :  { %298 = vadd.xlane.f32.xlu1 %v297_v31 }
 0x1cb   :  { %v286_v32 = vpop.f32.mrf.mxu3 }
 0x1cc   :  { %v296_v33 = vmul.f32 %v286_v32, %v286_v32  ;;  %v292_v34 = vsel %vm168_vm0, %v286_v32, 0.0 }
 0x1cd   :  { %293 = vadd.xlane.f32.xlu0 %v292_v34 }
 0x1ce   :  { %v300_v35 = vsel %vm168_vm0, %v296_v33, 0.0 }
 0x1cf   :  { %301 = vadd.xlane.f32.xlu1 %v300_v35 }
 0x238   :  { %v291_v36 = vpop.xlane.xlu0 %290 }
 0x239   :  { %v303_v37 = vmul.f32 0.03125, %v291_v36 }
 0x23a   :  { %v299_v38 = vpop.xlane.xlu1 %298 }
 0x23b   :  { %v307_v39 = vmul.f32 %v303_v37, %v303_v37  ;;  %v305_v40 = vmul.f32 0.03125, %v299_v38  ;;  %v311_v58 = vsub.f32 %v284_v28, %v303_v37 }
 0x23d   :  { %v309_v41 = vsub.f32 %v305_v40, %v307_v39 }
 0x23f   :  { %v313_v42 = vadd.f32 1e-05, %v309_v41 }
 0x240   :  { %v294_v43 = vpop.xlane.xlu0 %293 }
 0x241   :  { %640 = vrsqrt.f32 %v313_v42  ;;  %v304_v44 = vmul.f32 0.03125, %v294_v43  ;;  %vm321_vm3 = vweird.f32 %v313_v42 }
 0x242   :  { %v302_v45 = vpop.xlane.xlu1 %301 }
 0x243   :  { %v308_v46 = vmul.f32 %v304_v44, %v304_v44  ;;  %v306_v47 = vmul.f32 0.03125, %v302_v45  ;;  %v312_v4 = vsub.f32 %v286_v32, %v304_v44 }
 0x245   :  { %v310_v48 = vsub.f32 %v306_v47, %v308_v46 }
 0x247   :  { %v641_v49 = vpop.eup %640  ;;  %v314_v50 = vadd.f32 1e-05, %v310_v48 }
 0x248   :  { %v316_v51 = vmul.f32 %v641_v49, %v313_v42  ;;  %vm322_vm2 = vweird.f32 %v641_v49 }
 0x249   :  { %642 = vrsqrt.f32 %v314_v50  ;;  %vm323_vm4 = vmor %vm321_vm3, %vm322_vm2  ;;  %vm331_vm6 = vweird.f32 %v314_v50 }
 0x24a   :  { %v317_v52 = vmul.f32 %v641_v49, %v316_v51 }
 0x24c   :  { %v318_v53 = vmul.f32 0.5, %v317_v52 }
 0x24e   :  { %v319_v54 = vsub.f32 1.5, %v318_v53 }
 0x24f   :  { %v643_v55 = vpop.eup %642 }
 0x250   :  { %v320_v56 = vmul.f32 %v641_v49, %v319_v54  ;;  %v326_v57 = vmul.f32 %v643_v55, %v314_v50  ;;  %vm332_vm5 = vweird.f32 %v643_v55 }
 0x251   :  { %vm333_vm7 = vmor %vm331_vm6, %vm332_vm5 }
 0x252   :  { %v324_v59 = vsel %vm323_vm4, %v641_v49, %v320_v56  ;;  %v327_v60 = vmul.f32 %v643_v55, %v326_v57 }
 0x253   :  { %v335_v62 = vmul.f32 %v324_v59, %v311_v58 }
 0x254   :  { %v328_v63 = vmul.f32 0.5, %v327_v60 }
 0x255   :  { %v340_v1 = vmul.f32 %v983_v61, %v335_v62 }
 0x256   :  { %v329_v0 = vsub.f32 1.5, %v328_v63 }
 0x257   :  { %v345_v7 = vadd.f32 %v986_v2, %v340_v1 }
 0x258   :  { %v330_v3 = vmul.f32 %v643_v55, %v329_v0 }
 0x259   :  { %v347_v10 = vmax.f32 %v345_v7, 0.0 }
 0x25a   :  { %v334_v5 = vsel %vm333_vm7, %v643_v55, %v330_v3 }
 0x25b   :  { %v336_v6 = vmul.f32 %v334_v5, %v312_v4  ;;  %v349_v12 = vadd.f32 %v347_v10, %v251_v25 }
 0x25d   :  { %v341_v8 = vmul.f32 %v983_v61, %v336_v6 }
 0x25f   :  { %v346_v9 = vadd.f32 %v986_v2, %v341_v8 }
 0x261   :  { %v348_v11 = vmax.f32 %v346_v9, 0.0 }
 0x263   :  { %v350_v13 = vadd.f32 %v348_v11, %v252_v26 }
 0x265   :  { %v351_v14 = vpack.c.bf16 %v350_v13, %v349_v12 }
 0x267   :  { %599 = vmatmul.msk.bf16.vlgmr.msrb.gmra.mxu1 %vm168_vm0, %v351_v14 }
 0x2e4   :  { %v364_v15 = vpop.f32.mrf.mxu1 }
 0x2e5   :  { %v369_v16 = vsel %vm168_vm0, %v364_v15, 0.0  ;;  %v375_v17 = vmul.f32 %v364_v15, %v364_v15 }
 0x2e6   :  { %370 = vadd.xlane.f32.xlu2 %v369_v16  ;;  %v619_v16 = vld [vmem:[%s1046_s9 + $0x8] sm:$0xff] }
 0x2e7   :  { %v377_v18 = vsel %vm168_vm0, %v375_v17, 0.0  ;;  %529 = vmatpush.bf16.msrb.mxu2 %v619_v16 }
 0x2e8   :  { %378 = vadd.xlane.f32.xlu0 %v377_v18  ;;  %v618_v18 = vld [vmem:[%s1046_s9] sm:$0xff] }
 0x2eb   :  { %530 = vmatpush.bf16.msrb.mxu2 %v618_v18 }
 0x2ec   :  { %v366_v19 = vpop.f32.mrf.mxu1 }
 0x2ed   :  { %v376_v20 = vmul.f32 %v366_v19, %v366_v19  ;;  %v372_v21 = vsel %vm168_vm0, %v366_v19, 0.0 }
 0x2ee   :  { %373 = vadd.xlane.f32.xlu2 %v372_v21 }
 0x2ef   :  { %v380_v22 = vsel %vm168_vm0, %v376_v20, 0.0 }
 0x2f0   :  { %381 = vadd.xlane.f32.xlu1 %v380_v22 }
 0x359   :  { %v371_v23 = vpop.xlane.xlu2 %370 }
 0x35a   :  { %v383_v24 = vmul.f32 0.03125, %v371_v23 }
 0x35b   :  { %v379_v25 = vpop.xlane.xlu0 %378 }
 0x35c   :  { %v387_v26 = vmul.f32 %v383_v24, %v383_v24  ;;  %v385_v27 = vmul.f32 0.03125, %v379_v25  ;;  %v391_v45 = vsub.f32 %v364_v15, %v383_v24 }
 0x35e   :  { %v389_v28 = vsub.f32 %v385_v27, %v387_v26 }
 0x360   :  { %v393_v29 = vadd.f32 1e-05, %v389_v28 }
 0x361   :  { %v374_v30 = vpop.xlane.xlu2 %373 }
 0x362   :  { %644 = vrsqrt.f32 %v393_v29  ;;  %v384_v31 = vmul.f32 0.03125, %v374_v30  ;;  %vm401_vm9 = vweird.f32 %v393_v29 }
 0x363   :  { %v382_v32 = vpop.xlane.xlu1 %381 }
 0x364   :  { %v388_v33 = vmul.f32 %v384_v31, %v384_v31  ;;  %v386_v34 = vmul.f32 0.03125, %v382_v32  ;;  %v392_v53 = vsub.f32 %v366_v19, %v384_v31 }
 0x366   :  { %v390_v35 = vsub.f32 %v386_v34, %v388_v33 }
 0x368   :  { %v645_v36 = vpop.eup %644  ;;  %v394_v37 = vadd.f32 1e-05, %v390_v35 }
 0x369   :  { %v396_v38 = vmul.f32 %v645_v36, %v393_v29  ;;  %vm402_vm8 = vweird.f32 %v645_v36 }
 0x36a   :  { %646 = vrsqrt.f32 %v394_v37  ;;  %vm403_vm10 = vmor %vm401_vm9, %vm402_vm8  ;;  %vm411_vm12 = vweird.f32 %v394_v37 }
 0x36b   :  { %v397_v39 = vmul.f32 %v645_v36, %v396_v38 }
 0x36d   :  { %v398_v40 = vmul.f32 0.5, %v397_v39 }
 0x36f   :  { %v399_v41 = vsub.f32 1.5, %v398_v40 }
 0x370   :  { %v647_v42 = vpop.eup %646 }
 0x371   :  { %v400_v43 = vmul.f32 %v645_v36, %v399_v41  ;;  %v406_v44 = vmul.f32 %v647_v42, %v394_v37  ;;  %vm412_vm11 = vweird.f32 %v647_v42 }
 0x372   :  { %vm413_vm13 = vmor %vm411_vm12, %vm412_vm11 }
 0x373   :  { %v404_v46 = vsel %vm403_vm10, %v645_v36, %v400_v43  ;;  %v407_v47 = vmul.f32 %v647_v42, %v406_v44 }
 0x374   :  { %v415_v48 = vmul.f32 %v404_v46, %v391_v45 }
 0x375   :  { %v408_v49 = vmul.f32 0.5, %v407_v47 }
 0x376   :  { %v417_v51 = vmul.f32 %v983_v61, %v415_v48 }
 0x377   :  { %v409_v50 = vsub.f32 1.5, %v408_v49 }
 0x378   :  { %v419_v56 = vadd.f32 %v986_v2, %v417_v51 }
 0x379   :  { %v410_v52 = vmul.f32 %v647_v42, %v409_v50 }
 0x37a   :  { %v421_v59 = vmax.f32 %v419_v56, 0.0 }
 0x37b   :  { %v414_v54 = vsel %vm413_vm13, %v647_v42, %v410_v52 }
 0x37c   :  { %v416_v55 = vmul.f32 %v414_v54, %v392_v53  ;;  %v1004_v62 = vadd.f32 %v421_v59, %v349_v12  ;;  %v639_v54 = vld [vmem:[%s1047_s10] ss:$0 sm:$0xff] }
 0x37e   :  { %v418_v57 = vmul.f32 %v983_v61, %v416_v55 }
 0x380   :  { %v420_v58 = vadd.f32 %v986_v2, %v418_v57 }
 0x382   :  { %v422_v60 = vmax.f32 %v420_v58, 0.0 }
 0x384   :  { %v1006_v63 = vadd.f32 %v422_v60, %v350_v13 }
 0x386   :  { %v425_v0 = vpack.c.bf16 %v1006_v63, %v1004_v62 }
 0x388   :  { %600 = vmatmul.msk.bf16.vlgmr.msrb.gmra.mxu0 %vm168_vm0, %v425_v0 }
 0x405   :  { %v438_v1 = vpop.f32.mrf.mxu0 }
 0x406   :  { %v443_v3 = vsel %vm168_vm0, %v438_v1, 0.0  ;;  %v449_v4 = vmul.f32 %v438_v1, %v438_v1 }
 0x407   :  { %444 = vadd.xlane.f32.xlu2 %v443_v3 }
 0x408   :  { %v451_v5 = vsel %vm168_vm0, %v449_v4, 0.0 }
 0x409   :  { %452 = vadd.xlane.f32.xlu1 %v451_v5 }
 0x40d   :  { %v440_v6 = vpop.f32.mrf.mxu0 }
 0x40e   :  { %v450_v7 = vmul.f32 %v440_v6, %v440_v6  ;;  %v446_v8 = vsel %vm168_vm0, %v440_v6, 0.0 }
 0x40f   :  { %447 = vadd.xlane.f32.xlu0 %v446_v8 }
 0x410   :  { %v454_v9 = vsel %vm168_vm0, %v450_v7, 0.0 }
 0x411   :  { %455 = vadd.xlane.f32.xlu2 %v454_v9 }
 0x47a   :  { %v445_v10 = vpop.xlane.xlu2 %444 }
 0x47b   :  { %v457_v11 = vmul.f32 0.03125, %v445_v10 }
 0x47c   :  { %v453_v12 = vpop.xlane.xlu1 %452 }
 0x47d   :  { %v461_v13 = vmul.f32 %v457_v11, %v457_v11  ;;  %v459_v14 = vmul.f32 0.03125, %v453_v12  ;;  %v465_v34 = vsub.f32 %v438_v1, %v457_v11 }
 0x47f   :  { %v463_v15 = vsub.f32 %v459_v14, %v461_v13 }
 0x481   :  { %v467_v17 = vadd.f32 1e-05, %v463_v15 }
 0x482   :  { %v448_v19 = vpop.xlane.xlu0 %447 }
 0x483   :  { %648 = vrsqrt.f32 %v467_v17  ;;  %v458_v20 = vmul.f32 0.03125, %v448_v19  ;;  %vm475_vm15 = vweird.f32 %v467_v17 }
 0x484   :  { %v456_v21 = vpop.xlane.xlu2 %455 }
 0x485   :  { %v462_v22 = vmul.f32 %v458_v20, %v458_v20  ;;  %v460_v23 = vmul.f32 0.03125, %v456_v21  ;;  %v466_v42 = vsub.f32 %v440_v6, %v458_v20 }
 0x487   :  { %v464_v24 = vsub.f32 %v460_v23, %v462_v22 }
 0x489   :  { %v649_v25 = vpop.eup %648  ;;  %v468_v26 = vadd.f32 1e-05, %v464_v24 }
 0x48a   :  { %v470_v27 = vmul.f32 %v649_v25, %v467_v17  ;;  %vm476_vm14 = vweird.f32 %v649_v25 }
 0x48b   :  { %650 = vrsqrt.f32 %v468_v26  ;;  %vm477_vm1 = vmor %vm475_vm15, %vm476_vm14  ;;  %vm485_vm3 = vweird.f32 %v468_v26 }
 0x48c   :  { %v471_v28 = vmul.f32 %v649_v25, %v470_v27 }
 0x48e   :  { %v472_v29 = vmul.f32 0.5, %v471_v28 }
 0x490   :  { %v473_v30 = vsub.f32 1.5, %v472_v29 }
 0x491   :  { %v651_v31 = vpop.eup %650 }
 0x492   :  { %v474_v32 = vmul.f32 %v649_v25, %v473_v30  ;;  %v480_v33 = vmul.f32 %v651_v31, %v468_v26  ;;  %vm486_vm2 = vweird.f32 %v651_v31 }
 0x493   :  { %vm487_vm4 = vmor %vm485_vm3, %vm486_vm2 }
 0x494   :  { %v478_v35 = vsel %vm477_vm1, %v649_v25, %v474_v32  ;;  %v481_v36 = vmul.f32 %v651_v31, %v480_v33 }
 0x495   :  { %v489_v37 = vmul.f32 %v478_v35, %v465_v34 }
 0x496   :  { %v482_v38 = vmul.f32 0.5, %v481_v36 }
 0x497   :  { %v491_v40 = vmul.f32 %v983_v61, %v489_v37 }
 0x498   :  { %v483_v39 = vsub.f32 1.5, %v482_v38 }
 0x499   :  { %v493_v45 = vadd.f32 %v986_v2, %v491_v40 }
 0x49a   :  { %v484_v41 = vmul.f32 %v651_v31, %v483_v39 }
 0x49b   :  { %v495_v48 = vmax.f32 %v493_v45, 0.0 }
 0x49c   :  { %v488_v43 = vsel %vm487_vm4, %v651_v31, %v484_v41 }
 0x49d   :  { %v490_v44 = vmul.f32 %v488_v43, %v466_v42  ;;  %v497_v50 = vadd.f32 %v495_v48, %v1004_v62 }
 0x49f   :  { %v492_v46 = vmul.f32 %v983_v61, %v490_v44 }
 0x4a1   :  { %v494_v47 = vadd.f32 %v986_v2, %v492_v46 }
 0x4a3   :  { %v496_v49 = vmax.f32 %v494_v47, 0.0 }
 0x4a5   :  { %v498_v51 = vadd.f32 %v496_v49, %v1006_v63 }
 0x4a7   :  { %v499_v52 = vpack.c.bf16 %v498_v51, %v497_v50 }
 0x4a9   :  { %609 = vmatmul.msk.bf16.vlgmr.msrb.gmra.mxu2 %vm168_vm0, %v499_v52 }
 0x52c   :  { %v532_v53 = vpop.f32.mrf.mxu2 }
 0x52d   :  { %v533_v61 = vadd.f32 %v639_v54, %v532_v53 }
 0x534   :  { %v534_v55 = vpop.f32.mrf.mxu2 }
 0x535   :  { %v535_v2 = vadd.f32 %v639_v54, %v534_v55 }
 0x537   :  { %v623_v56 = vpack.c.bf16 %v535_v2, %v533_v61 }
 0x539   :  { %624 = vst [vmem:[#allocation14] sm:$0xff] %v623_v56  }
 0x53a   :  { %553 = dma.vmem_to_hbm [thread:$0]  %s546_s0, 128, %s548_s22, [#allocation4], %s858_s16, %s858_s16, %s859_s17  }
 0x53b   :  { %852 = dma.done.wait [#allocation4], 128  }
 0x53c   :  { %853 = vsyncadd [#allocation4], 4294967168 }
 0x53d   :  { %558 = vsyncpa [#allocation3], 1 }
 0x53e   :  { %559 = vsyncpa [#allocation6], 1 }
 0x53f   :  { %560 = vsyncpa [#allocation9], 1 }
 0x540   :  { %561 = vsyncpa [#allocation12], 1 }
 0x541   :  { %562 = vsyncpa [#allocation4], 1 }

</bundles_post_ra>
